<compile_context>
chip_gen: v6e
topology: v6e:2x2x1
jax: 0.10.0
libtpu: 0.0.40
codegen_flags: <defaults>
</compile_context>

<pallas_src>
import jax
import jax.numpy as jnp
from jax.experimental import pallas as pl
from jax.experimental.pallas import tpu as pltpu


def rnn_kernel(x_ref, wih_ref, whh_ref, b_ref, hout_ref, xw_ref):
    """Single-invocation Elman RNN forward.

    x_ref   : (T*B, D)  time-major, flattened input
    wih_ref : (D, H)    W_ih^T
    whh_ref : (H, H)    W_hh^T
    b_ref   : (1, H)    b_ih + b_hh
    hout_ref: (B, H)    last hidden state (lane-dense output)
    xw_ref  : (T*B, H)  VMEM scratch: hoisted input projection for all steps
    """
    TB, _ = x_ref.shape
    B, H = hout_ref.shape
    T = TB // B

    # Pre-pass: input projection for ALL timesteps in one parallel MXU matmul,
    # with the (hoisted) biases folded in.  (T*B, D) @ (D, H) + (1, H).
    xw_ref[...] = (
        jnp.dot(x_ref[...], wih_ref[...], preferred_element_type=jnp.float32)
        + b_ref[...]
    )

    whh = whh_ref[...]  # load recurrent weights once, keep in vregs

    def step(t, h):
        # h_t = tanh(xW[t] + h_{t-1} @ W_hh^T)
        start = pl.multiple_of(t * B, B)
        xw_t = xw_ref[pl.ds(start, B), :]
        return jnp.tanh(
            xw_t + jnp.dot(h, whh, preferred_element_type=jnp.float32)
        )

    h_last = jax.lax.fori_loop(
        0, T, step, jnp.zeros((B, H), jnp.float32), unroll=True
    )
    hout_ref[...] = h_last


def rnn_forward(x_btd, w_ih, w_hh, b_ih, b_hh, w_fc, b_fc):
    """x_btd: (B, T, D) float32, batch_first like PyTorch.
    w_ih: (H, D), w_hh: (H, H), b_ih/b_hh: (H,), w_fc: (1, H), b_fc: (1,)."""
    B, T, D = x_btd.shape
    H = w_hh.shape[0]

    # Layout plumbing in the wrapper (cheap XLA ops, outside the kernel).
    x_flat = jnp.transpose(x_btd, (1, 0, 2)).reshape(T * B, D)  # time-major
    wih_t = jnp.transpose(w_ih)                                 # (D, H)
    whh_t = jnp.transpose(w_hh)                                 # (H, H)
    b = (b_ih + b_hh).reshape(1, H)                             # (1, H)

    h_last = pl.pallas_call(
        rnn_kernel,
        out_shape=jax.ShapeDtypeStruct((B, H), jnp.float32),
        in_specs=[
            pl.BlockSpec((T * B, D), lambda: (0, 0)),   # x (whole, ~8 KB)
            pl.BlockSpec((D, H), lambda: (0, 0)),       # W_ih^T
            pl.BlockSpec((H, H), lambda: (0, 0)),       # W_hh^T
            pl.BlockSpec((1, H), lambda: (0, 0)),       # b_ih + b_hh
        ],
        out_specs=pl.BlockSpec((B, H), lambda: (0, 0)), # lane-dense h_last
        scratch_shapes=[pltpu.VMEM((T * B, H), jnp.float32)],
    )(x_flat, wih_t, whh_t, b)

    # 1-wide FC (8x64 FLOPs) + squeeze done in the wrapper; keeps the kernel's
    # store lane-dense and drops two kernel inputs.
    pred = h_last @ jnp.transpose(w_fc) + b_fc.reshape(1, 1)    # (B, 1)
    return jnp.squeeze(pred, axis=-1)                           # matches .squeeze()


def rnn_forward_ref(x_btd, w_ih, w_hh, b_ih, b_hh, w_fc, b_fc):
    """Pure-JAX reference for correctness checking."""
    B, T, D = x_btd.shape
    H = w_hh.shape[0]

    def step(h, x_t):
        h_new = jnp.tanh(x_t @ w_ih.T + b_ih + h @ w_hh.T + b_hh)
        return h_new, None

    h0 = jnp.zeros((B, H), jnp.float32)
    h_last, _ = jax.lax.scan(step, h0, jnp.transpose(x_btd, (1, 0, 2)))
    pred = h_last @ w_fc.T + b_fc
    return jnp.squeeze(pred, axis=-1)


if __name__ == "__main__":
    # Small shapes consistent with the module: input_size=32, hidden_size=64.
    B, T, D, H = 8, 8, 32, 64

    key = jax.random.PRNGKey(0)
    kx, k1, k2, k3, k4, k5, k6 = jax.random.split(key, 7)

    # Deterministic parameter init (PyTorch-style uniform(-1/sqrt(H), 1/sqrt(H))).
    s = 1.0 / jnp.sqrt(jnp.float32(H))
    x = jax.random.normal(kx, (B, T, D), jnp.float32)
    w_ih = jax.random.uniform(k1, (H, D), jnp.float32, -s, s)
    w_hh = jax.random.uniform(k2, (H, H), jnp.float32, -s, s)
    b_ih = jax.random.uniform(k3, (H,), jnp.float32, -s, s)
    b_hh = jax.random.uniform(k4, (H,), jnp.float32, -s, s)
    w_fc = jax.random.uniform(k5, (1, H), jnp.float32, -s, s)
    b_fc = jax.random.uniform(k6, (1,), jnp.float32, -s, s)

    pred = jax.block_until_ready(
        rnn_forward(x, w_ih, w_hh, b_ih, b_hh, w_fc, b_fc)
    )
    ref = rnn_forward_ref(x, w_ih, w_hh, b_ih, b_hh, w_fc, b_fc)

    assert pred.shape == (B,), pred.shape
    assert jnp.allclose(pred, ref, atol=2e-5, rtol=2e-5), (pred, ref)

    print("KERNEL_OK")
</pallas_src>

<mosaic_0001>
module attributes {stable_mosaic.version = 11 : i64} {
  func.func @rnn_kernel(%arg0: memref<64x32xf32, #tpu.memory_space<vmem>>, %arg1: memref<32x64xf32, #tpu.memory_space<vmem>>, %arg2: memref<64x64xf32, #tpu.memory_space<vmem>>, %arg3: memref<1x64xf32, #tpu.memory_space<vmem>>, %arg4: memref<8x64xf32, #tpu.memory_space<vmem>>, %arg5: memref<64x64xf32, #tpu.memory_space<vmem>>) attributes {dimension_semantics = [], scalar_prefetch = 0 : i64, scratch_operands = 1 : i64, tpu.core_type = #tpu.core_type<tc>} {
    %c0 = arith.constant 0 : index
    %c0_0 = arith.constant 0 : index
    %0 = vector.load %arg0[%c0, %c0_0] : memref<64x32xf32, #tpu.memory_space<vmem>>, vector<64x32xf32>
    %c0_1 = arith.constant 0 : index
    %c0_2 = arith.constant 0 : index
    %1 = vector.load %arg1[%c0_1, %c0_2] : memref<32x64xf32, #tpu.memory_space<vmem>>, vector<32x64xf32>
    %cst = arith.constant dense<0.000000e+00> : vector<64x64xf32>
    %2 = tpu.matmul %0, %1, %cst {dimension_numbers = #tpu.dot_dimension_numbers<[1], [0], [0], [1], [0, 0, 1, 1], [], []>} : vector<64x32xf32>, vector<32x64xf32>, vector<64x64xf32> -> vector<64x64xf32>
    %c0_3 = arith.constant 0 : index
    %c0_4 = arith.constant 0 : index
    %3 = vector.load %arg3[%c0_3, %c0_4] : memref<1x64xf32, #tpu.memory_space<vmem>>, vector<1x64xf32>
    %4 = vector.broadcast %3 : vector<1x64xf32> to vector<64x64xf32>
    %5 = arith.addf %2, %4 : vector<64x64xf32>
    %c0_5 = arith.constant 0 : index
    %c0_6 = arith.constant 0 : index
    %6 = vector.load %arg5[%c0_5, %c0_6] : memref<64x64xf32, #tpu.memory_space<vmem>>, vector<64x64xf32>
    tpu.vector_store %arg5[%c0_5, %c0_6], %5 {strides = array<i32>} : memref<64x64xf32, #tpu.memory_space<vmem>>, vector<64x64xf32>,
    %c0_7 = arith.constant 0 : index
    %c0_8 = arith.constant 0 : index
    %7 = vector.load %arg2[%c0_7, %c0_8] : memref<64x64xf32, #tpu.memory_space<vmem>>, vector<64x64xf32>
    %cst_9 = arith.constant 0.000000e+00 : f32
    %8 = vector.broadcast %cst_9 : f32 to vector<8x64xf32>
    %c0_i32 = arith.constant 0 : i32
    %c8_i32 = arith.constant 8 : i32
    %9 = arith.muli %c0_i32, %c8_i32 : i32
    %10 = tpu.assume_multiple %9, 8 : i32
    %11 = arith.index_cast %10 : i32 to index
    %c0_10 = arith.constant 0 : index
    %12 = vector.load %arg5[%11, %c0_10] : memref<64x64xf32, #tpu.memory_space<vmem>>, vector<8x64xf32>
    %cst_11 = arith.constant dense<0.000000e+00> : vector<8x64xf32>
    %13 = tpu.matmul %8, %7, %cst_11 {dimension_numbers = #tpu.dot_dimension_numbers<[1], [0], [0], [1], [0, 0, 1, 1], [], []>} : vector<8x64xf32>, vector<64x64xf32>, vector<8x64xf32> -> vector<8x64xf32>
    %14 = arith.addf %12, %13 : vector<8x64xf32>
    %15 = math.tanh %14 : vector<8x64xf32>
    %c1_i32 = arith.constant 1 : i32
    %c8_i32_12 = arith.constant 8 : i32
    %16 = arith.muli %c1_i32, %c8_i32_12 : i32
    %17 = tpu.assume_multiple %16, 8 : i32
    %18 = arith.index_cast %17 : i32 to index
    %c0_13 = arith.constant 0 : index
    %19 = vector.load %arg5[%18, %c0_13] : memref<64x64xf32, #tpu.memory_space<vmem>>, vector<8x64xf32>
    %cst_14 = arith.constant dense<0.000000e+00> : vector<8x64xf32>
    %20 = tpu.matmul %15, %7, %cst_14 {dimension_numbers = #tpu.dot_dimension_numbers<[1], [0], [0], [1], [0, 0, 1, 1], [], []>} : vector<8x64xf32>, vector<64x64xf32>, vector<8x64xf32> -> vector<8x64xf32>
    %21 = arith.addf %19, %20 : vector<8x64xf32>
    %22 = math.tanh %21 : vector<8x64xf32>
    %c2_i32 = arith.constant 2 : i32
    %c8_i32_15 = arith.constant 8 : i32
    %23 = arith.muli %c2_i32, %c8_i32_15 : i32
    %24 = tpu.assume_multiple %23, 8 : i32
    %25 = arith.index_cast %24 : i32 to index
    %c0_16 = arith.constant 0 : index
    %26 = vector.load %arg5[%25, %c0_16] : memref<64x64xf32, #tpu.memory_space<vmem>>, vector<8x64xf32>
    %cst_17 = arith.constant dense<0.000000e+00> : vector<8x64xf32>
    %27 = tpu.matmul %22, %7, %cst_17 {dimension_numbers = #tpu.dot_dimension_numbers<[1], [0], [0], [1], [0, 0, 1, 1], [], []>} : vector<8x64xf32>, vector<64x64xf32>, vector<8x64xf32> -> vector<8x64xf32>
    %28 = arith.addf %26, %27 : vector<8x64xf32>
    %29 = math.tanh %28 : vector<8x64xf32>
    %c3_i32 = arith.constant 3 : i32
    %c8_i32_18 = arith.constant 8 : i32
    %30 = arith.muli %c3_i32, %c8_i32_18 : i32
    %31 = tpu.assume_multiple %30, 8 : i32
    %32 = arith.index_cast %31 : i32 to index
    %c0_19 = arith.constant 0 : index
    %33 = vector.load %arg5[%32, %c0_19] : memref<64x64xf32, #tpu.memory_space<vmem>>, vector<8x64xf32>
    %cst_20 = arith.constant dense<0.000000e+00> : vector<8x64xf32>
    %34 = tpu.matmul %29, %7, %cst_20 {dimension_numbers = #tpu.dot_dimension_numbers<[1], [0], [0], [1], [0, 0, 1, 1], [], []>} : vector<8x64xf32>, vector<64x64xf32>, vector<8x64xf32> -> vector<8x64xf32>
    %35 = arith.addf %33, %34 : vector<8x64xf32>
    %36 = math.tanh %35 : vector<8x64xf32>
    %c4_i32 = arith.constant 4 : i32
    %c8_i32_21 = arith.constant 8 : i32
    %37 = arith.muli %c4_i32, %c8_i32_21 : i32
    %38 = tpu.assume_multiple %37, 8 : i32
    %39 = arith.index_cast %38 : i32 to index
    %c0_22 = arith.constant 0 : index
    %40 = vector.load %arg5[%39, %c0_22] : memref<64x64xf32, #tpu.memory_space<vmem>>, vector<8x64xf32>
    %cst_23 = arith.constant dense<0.000000e+00> : vector<8x64xf32>
    %41 = tpu.matmul %36, %7, %cst_23 {dimension_numbers = #tpu.dot_dimension_numbers<[1], [0], [0], [1], [0, 0, 1, 1], [], []>} : vector<8x64xf32>, vector<64x64xf32>, vector<8x64xf32> -> vector<8x64xf32>
    %42 = arith.addf %40, %41 : vector<8x64xf32>
    %43 = math.tanh %42 : vector<8x64xf32>
    %c5_i32 = arith.constant 5 : i32
    %c8_i32_24 = arith.constant 8 : i32
    %44 = arith.muli %c5_i32, %c8_i32_24 : i32
    %45 = tpu.assume_multiple %44, 8 : i32
    %46 = arith.index_cast %45 : i32 to index
    %c0_25 = arith.constant 0 : index
    %47 = vector.load %arg5[%46, %c0_25] : memref<64x64xf32, #tpu.memory_space<vmem>>, vector<8x64xf32>
    %cst_26 = arith.constant dense<0.000000e+00> : vector<8x64xf32>
    %48 = tpu.matmul %43, %7, %cst_26 {dimension_numbers = #tpu.dot_dimension_numbers<[1], [0], [0], [1], [0, 0, 1, 1], [], []>} : vector<8x64xf32>, vector<64x64xf32>, vector<8x64xf32> -> vector<8x64xf32>
    %49 = arith.addf %47, %48 : vector<8x64xf32>
    %50 = math.tanh %49 : vector<8x64xf32>
    %c6_i32 = arith.constant 6 : i32
    %c8_i32_27 = arith.constant 8 : i32
    %51 = arith.muli %c6_i32, %c8_i32_27 : i32
    %52 = tpu.assume_multiple %51, 8 : i32
    %53 = arith.index_cast %52 : i32 to index
    %c0_28 = arith.constant 0 : index
    %54 = vector.load %arg5[%53, %c0_28] : memref<64x64xf32, #tpu.memory_space<vmem>>, vector<8x64xf32>
    %cst_29 = arith.constant dense<0.000000e+00> : vector<8x64xf32>
    %55 = tpu.matmul %50, %7, %cst_29 {dimension_numbers = #tpu.dot_dimension_numbers<[1], [0], [0], [1], [0, 0, 1, 1], [], []>} : vector<8x64xf32>, vector<64x64xf32>, vector<8x64xf32> -> vector<8x64xf32>
    %56 = arith.addf %54, %55 : vector<8x64xf32>
    %57 = math.tanh %56 : vector<8x64xf32>
    %c7_i32 = arith.constant 7 : i32
    %c8_i32_30 = arith.constant 8 : i32
    %58 = arith.muli %c7_i32, %c8_i32_30 : i32
    %59 = tpu.assume_multiple %58, 8 : i32
    %60 = arith.index_cast %59 : i32 to index
    %c0_31 = arith.constant 0 : index
    %61 = vector.load %arg5[%60, %c0_31] : memref<64x64xf32, #tpu.memory_space<vmem>>, vector<8x64xf32>
    %cst_32 = arith.constant dense<0.000000e+00> : vector<8x64xf32>
    %62 = tpu.matmul %57, %7, %cst_32 {dimension_numbers = #tpu.dot_dimension_numbers<[1], [0], [0], [1], [0, 0, 1, 1], [], []>} : vector<8x64xf32>, vector<64x64xf32>, vector<8x64xf32> -> vector<8x64xf32>
    %63 = arith.addf %61, %62 : vector<8x64xf32>
    %64 = math.tanh %63 : vector<8x64xf32>
    %c8_i32_33 = arith.constant 8 : i32
    %c0_34 = arith.constant 0 : index
    %c0_35 = arith.constant 0 : index
    %65 = vector.load %arg4[%c0_34, %c0_35] : memref<8x64xf32, #tpu.memory_space<vmem>>, vector<8x64xf32>
    tpu.vector_store %arg4[%c0_34, %c0_35], %64 {strides = array<i32>} : memref<8x64xf32, #tpu.memory_space<vmem>>, vector<8x64xf32>,
    return
  }
}

</mosaic_0001>

<bundles_post_ra>
// kernel: tpu_custom_call.1
= control target key start
LH: loop header
LB: loop body
LE: loop exit
PB: predicated region body
PF: predicated region fallthrough
CT: control target
= control target key end

     0   :  { %v1127_v3 = vmov 0.0   ;;  %vm37_vm0 = vcmask 261120   ;;  %s1406_s0 = inlined_call_operand.vmem [shape: f32[64,32], index: 0, kind: input, shape index: {}]   ;;  %s1407_s1 = inlined_call_operand.vmem [shape: f32[32,64], index: 1, kind: input, shape index: {}]   ;;  %s1408_s2 = inlined_call_operand.vmem [shape: f32[64,64], index: 2, kind: input, shape index: {}]   ;;  %s1409_s3 = inlined_call_operand.vmem [shape: f32[1,64], index: 3, kind: input, shape index: {}]   ;;  %s1410_s4 = inlined_call_operand.hbm [shape: f32[8,64], index: 4, kind: output, shape index: {}]  }
   0x1   :  { %v29_v0 = vld [vmem:[%s1407_s1 + $0x18] sm:$0xff]  ;;  %v28_v1 = vld [vmem:[%s1407_s1 + $0x10] sm:$0xff]  ;;  %934 = vmatprep.subr.mxu1 %v1127_v3  ;;  %v27_v5 = vld [vmem:[%s1407_s1 + $0x8] sm:$0xff] }
   0x2   :  { %v1164_v2 = vld [vmem:[%s1408_s2 + $0x38] sm:$0xff]  ;;  %914 = vmatprep.subr.mxu0 %v29_v0  ;;  %v1170_v4 = vld [vmem:[%s1408_s2 + $0x30] sm:$0xff]  ;;  %v18_v6 = vld [vmem:[%s1406_s0] sm:$0xff] }
   0x3   :  { %915 = vmatpush3.msra.mxu0 %v29_v0  ;;  %935 = vmatpush3.msra.mxu1 %v1164_v2  ;;  %v26_v7 = vld [vmem:[%s1407_s1] sm:$0xff]  ;;  %v1187_v8 = vld [vmem:[%s1408_s2 + $0x28] sm:$0xff] }
   0x4   :  { %916 = vmatprep.subr.mxu0 %v28_v1  ;;  %936 = vmatprep.subr.mxu1 %v1127_v3 }
   0x5   :  { %917 = vmatpush3.msra.mxu0 %v28_v1  ;;  %937 = vmatpush3.msra.mxu1 %v1170_v4 }
   0x6   :  { %9 = vsyncpa [#allocation4], 0  ;;  %918 = vmatprep.subr.mxu0 %v27_v5  ;;  %938 = vmatprep.subr.mxu1 %v1127_v3  ;;  %v19_v9 = vld [vmem:[%s1406_s0 + $0x8] sm:$0xff]  ;;  %v1197_v10 = vld [vmem:[%s1408_s2 + $0x20] sm:$0xff]  ;;  %vm1128_vm1 = vmmov 0   ;;  %vm167_vm2 = vcmask 523264  }
   0x7   :  { %919 = vmatpush3.msra.mxu0 %v27_v5  ;;  %922 = vmatprep.mubr.msk.f32.mxu0 %vm37_vm0, %v18_v6  ;;  %v1204_v11 = vld [vmem:[%s1408_s2 + $0x18] sm:$0xff]  ;;  %v1212_v12 = vld [vmem:[%s1408_s2 + $0x10] sm:$0xff]  ;;  %v1222_v13 = vld [vmem:[%s1408_s2 + $0x8] sm:$0xff] }
   0x8   :  { %920 = vmatprep.subr.mxu0 %v26_v7  ;;  %939 = vmatpush3.msra.mxu1 %v1187_v8  ;;  %v1231_v14 = vld [vmem:[%s1408_s2] sm:$0xff]  ;;  %v20_v15 = vld [vmem:[%s1406_s0 + $0x10] sm:$0xff]  ;;  %v21_v16 = vld [vmem:[%s1406_s0 + $0x18] sm:$0xff] }
   0x9   :  { %921 = vmatpush3.msra.mxu0 %v26_v7  ;;  %940 = vmatprep.subr.mxu1 %v1127_v3  ;;  %v22_v17 = vld [vmem:[%s1406_s0 + $0x20] sm:$0xff]  ;;  %v23_v18 = vld [vmem:[%s1406_s0 + $0x28] sm:$0xff]  ;;  %v24_v19 = vld [vmem:[%s1406_s0 + $0x30] sm:$0xff] }
   0xa   :  { %923 = vmatmul.mubr.msk.f32.vlgmr.msra.gmra.mxu0 %vm37_vm0, %v19_v9  ;;  %941 = vmatpush3.msra.mxu1 %v1197_v10  ;;  %v25_v20 = vld [vmem:[%s1406_s0 + $0x38] sm:$0xff]  ;;  %v814_v21 = vld [vmem:[%s1409_s3] ss:$0 sm:$0xff]  ;;  %s1129_s0 = smov [#allocation3]  }
   0xb   :  { %942 = vmatprep.subr.mxu1 %v1127_v3  ;;  %950 = vmatprep.mubr.msk.f32.mxu1 %vm1128_vm1, %v1127_v3  ;;  %s806_s3 = sshll.u32 %s1129_s0, 4  ;;  %s807_s3 = int_to_ptr.vmem [resolvable:$true] %s806_s3 }
   0xc   :  { %943 = vmatpush3.msra.mxu1 %v1204_v11  ;;  %953 = vmatprep.subr.mxu0 %v1127_v3  ;;  %s1105_s29 = scalar_lea.vmem %s807_s3, 128  ;;  %p1110_p1 = scmp.lt.s32.totalorder %s807_s3, %s807_s3 }
   0xd   :  { %944 = vmatprep.subr.mxu1 %v1127_v3  ;;  %954 = vmatpush3.msra.mxu0 %v1164_v2  ;;  %p1106_p0 = scmp.ne.s32.totalorder %s807_s3, %s1105_s29  ;;  %p1111_p2 = scmp.lt.s32.totalorder %s1105_s29, %s1105_s29 }
   0xe   :  { %945 = vmatpush3.msra.mxu1 %v1212_v12  ;;  %955 = vmatprep.subr.mxu0 %v1127_v3 }
   0xf   :  { %946 = vmatprep.subr.mxu1 %v1127_v3  ;;  %956 = vmatpush3.msra.mxu0 %v1170_v4  ;;  %p1112_p3 = por %p1111_p2, %p1110_p1 }
  0x10   :  { %947 = vmatpush3.msra.mxu1 %v1222_v13  ;;  %957 = vmatprep.subr.mxu0 %v1127_v3 }
  0x11   :  { %948 = vmatprep.subr.mxu1 %v1127_v3  ;;  %958 = vmatpush3.msra.mxu0 %v1187_v8  ;;  %p1113_p4 = pnand %p1112_p3, %p1106_p0 }
  0x12   :  { %949 = vmatpush3.msra.mxu1 %v1231_v14  ;;  %959 = vmatprep.subr.mxu0 %v1127_v3 }
  0x13   :  { %951 = vmatmul.mubr.f32.vlgmr.msra.gmra.mxu1 %v1127_v3  ;;  %960 = vmatpush3.msra.mxu0 %v1197_v10 }
  0x14   :  { %961 = vmatprep.subr.mxu0 %v1127_v3  ;;  %972 = vmatprep.subr.mxu1 %v1127_v3 }
  0x15   :  { %962 = vmatpush3.msra.mxu0 %v1204_v11  ;;  %973 = vmatpush3.msra.mxu1 %v1164_v2 }
  0x16   :  { %963 = vmatprep.subr.mxu0 %v1127_v3  ;;  %974 = vmatprep.subr.mxu1 %v1127_v3 }
  0x17   :  { %964 = vmatpush3.msra.mxu0 %v1212_v12  ;;  %975 = vmatpush3.msra.mxu1 %v1170_v4 }
  0x18   :  { %965 = vmatprep.subr.mxu0 %v1127_v3  ;;  %976 = vmatprep.subr.mxu1 %v1127_v3 }
  0x19   :  { %966 = vmatpush3.msra.mxu0 %v1222_v13  ;;  %977 = vmatpush3.msra.mxu1 %v1187_v8 }
  0x1a   :  { %967 = vmatprep.subr.mxu0 %v1127_v3  ;;  %978 = vmatprep.subr.mxu1 %v1127_v3 }
  0x1b   :  { %968 = vmatpush3.msra.mxu0 %v1231_v14  ;;  %979 = vmatpush3.msra.mxu1 %v1197_v10 }
  0x1c   :  { %980 = vmatprep.subr.mxu1 %v1127_v3  ;;  %988 = vmatprep.mubr.msk.f32.mxu1 %vm1128_vm1, %v1127_v3 }
  0x1d   :  { %981 = vmatpush3.msra.mxu1 %v1204_v11  ;;  %991 = vmatprep.subr.mxu0 %v1127_v3 }
  0x1e   :  { %982 = vmatprep.subr.mxu1 %v1127_v3  ;;  %925 = vmatprep.mubr.msk.f32.mxu0 %vm37_vm0, %v20_v15 }
  0x1f   :  { %983 = vmatpush3.msra.mxu1 %v1212_v12  ;;  %926 = vmatmul.mubr.msk.f32.gmra.mxu0 %vm37_vm0, %v21_v16 }
  0x20   :  { %984 = vmatprep.subr.mxu1 %v1127_v3  ;;  %928 = vmatprep.mubr.msk.f32.mxu0 %vm37_vm0, %v22_v17 }
  0x21   :  { %985 = vmatpush3.msra.mxu1 %v1222_v13 }
  0x22   :  { %986 = vmatprep.subr.mxu1 %v1127_v3 }
  0x23   :  { %987 = vmatpush3.msra.mxu1 %v1231_v14  ;;  %929 = vmatmul.mubr.msk.f32.gmra.mxu0 %vm37_vm0, %v23_v18 }
  0x24   :  { %1010 = vmatprep.subr.mxu1 %v1127_v3  ;;  %931 = vmatprep.mubr.msk.f32.mxu0 %vm37_vm0, %v24_v19 }
  0x27   :  { %932 = vmatmul.mubr.msk.f32.gmra.mxu0 %vm37_vm0, %v25_v20 }
  0x28   :  { %969 = vmatprep.mubr.msk.f32.mxu0 %vm1128_vm1, %v1127_v3 }
  0xca   :  { %v924_v22 = vpop.f32.mrf.mxu0 }
  0xcb   :  { %v134_v23 = vadd.f32 %v924_v22, %v814_v21 }
  0xcc   :  { %v128_v24 = vpop.f32.mrf.mxu0 }
  0xcd   :  { %169 = vst.msk [vmem:[#allocation2 + $0x8] sm:$0xff] %vm167_vm2, %v134_v23  ;;  %v129_v25 = vadd.f32 %v814_v21, %v128_v24 }
  0xcf   :  { %168 = vst.msk [vmem:[#allocation2] sm:$0xff] %vm167_vm2, %v129_v25 }
  0xd3   :  { %v254_v26 = vpop.f32.mrf.mxu1 }
  0xd4   :  { %v261_v43 = vld [vmem:[#allocation2 + $0x8] sm:$0xff] }
  0xd5   :  { %v952_v27 = vpop.f32.mrf.mxu1 }
  0xd6   :  { %v184_v28 = vld [vmem:[#allocation2] sm:$0xff] }
  0xd7   :  { %v258_v29 = vadd.f32 %v254_v26, %v184_v28 }
  0xd9   :  { %1089 = vtanh.f32 %v258_v29 }
  0xdf   :  { %v927_v31 = vpop.f32.mrf.mxu0 }
  0xe0   :  { %v144_v32 = vadd.f32 %v927_v31, %v814_v21 }
  0xe1   :  { %v138_v33 = vpop.f32.mrf.mxu0 }
  0xe2   :  { %171 = vst.msk [vmem:[#allocation2 + $0x18] sm:$0xff] %vm167_vm2, %v144_v32  ;;  %v139_v34 = vadd.f32 %v814_v21, %v138_v33 }
  0xe3   :  { %v930_v35 = vpop.f32.mrf.mxu0 }
  0xe4   :  { %170 = vst.msk [vmem:[#allocation2 + $0x10] sm:$0xff] %vm167_vm2, %v139_v34  ;;  %v154_v36 = vadd.f32 %v930_v35, %v814_v21 }
  0xe5   :  { %v148_v37 = vpop.f32.mrf.mxu0 }
  0xe6   :  { %v1090_v30 = vpop.eup %1089  ;;  %173 = vst.msk [vmem:[#allocation2 + $0x28] sm:$0xff] %vm167_vm2, %v154_v36  ;;  %v149_v38 = vadd.f32 %v814_v21, %v148_v37 }
  0xe7   :  { %970 = vmatmul.mubr.msk.f32.vlgmr.msra.gmra.mxu0 %vm167_vm2, %v1090_v30  ;;  %v933_v39 = vpop.f32.mrf.mxu0 }
  0xe8   :  { %992 = vmatpush3.msra.mxu0 %v1164_v2  ;;  %1007 = vmatprep.mubr.msk.f32.mxu0 %vm1128_vm1, %v1127_v3  ;;  %172 = vst.msk [vmem:[#allocation2 + $0x20] sm:$0xff] %vm167_vm2, %v149_v38  ;;  %v164_v40 = vadd.f32 %v933_v39, %v814_v21 }
  0xe9   :  { %993 = vmatprep.subr.mxu0 %v1127_v3  ;;  %v158_v41 = vpop.f32.mrf.mxu0  ;;  %v415_v53 = vld [vmem:[#allocation2 + $0x18] sm:$0xff] }
  0xea   :  { %994 = vmatpush3.msra.mxu0 %v1170_v4  ;;  %175 = vst.msk [vmem:[#allocation2 + $0x38] sm:$0xff] %vm167_vm2, %v164_v40  ;;  %v159_v42 = vadd.f32 %v814_v21, %v158_v41 }
  0xeb   :  { %995 = vmatprep.subr.mxu0 %v1127_v3  ;;  %v338_v48 = vld [vmem:[#allocation2 + $0x10] sm:$0xff] }
  0xec   :  { %996 = vmatpush3.msra.mxu0 %v1187_v8  ;;  %174 = vst.msk [vmem:[#allocation2 + $0x30] sm:$0xff] %vm167_vm2, %v159_v42 }
  0xed   :  { %997 = vmatprep.subr.mxu0 %v1127_v3  ;;  %v569_v63 = vld [vmem:[#allocation2 + $0x28] sm:$0xff] }
  0xee   :  { %998 = vmatpush3.msra.mxu0 %v1197_v10 }
  0xef   :  { %999 = vmatprep.subr.mxu0 %v1127_v3  ;;  %v492_v58 = vld [vmem:[#allocation2 + $0x20] sm:$0xff] }
  0xf0   :  { %1000 = vmatpush3.msra.mxu0 %v1204_v11 }
  0xf1   :  { %1001 = vmatprep.subr.mxu0 %v1127_v3 }
  0xf2   :  { %1002 = vmatpush3.msra.mxu0 %v1212_v12 }
  0xf3   :  { %1003 = vmatprep.subr.mxu0 %v1127_v3  ;;  %v646_v5 = vld [vmem:[#allocation2 + $0x30] sm:$0xff] }
  0xf4   :  { %1004 = vmatpush3.msra.mxu0 %v1222_v13 }
  0xf5   :  { %1005 = vmatprep.subr.mxu0 %v1127_v3 }
  0xf6   :  { %1006 = vmatpush3.msra.mxu0 %v1231_v14 }
  0xf7   :  { %1029 = vmatprep.subr.mxu0 %v1127_v3 }
 0x1a7   :  { %v331_v44 = vpop.f32.mrf.mxu0 }
 0x1a8   :  { %v335_v45 = vadd.f32 %v331_v44, %v261_v43 }
 0x1a9   :  { %v971_v46 = vpop.f32.mrf.mxu0 }
 0x1aa   :  { %1091 = vtanh.f32 %v335_v45 }
 0x1b7   :  { %v1092_v47 = vpop.eup %1091 }
 0x1b8   :  { %989 = vmatmul.mubr.msk.f32.vlgmr.msra.gmra.mxu1 %vm167_vm2, %v1092_v47 }
 0x1b9   :  { %1011 = vmatpush3.msra.mxu1 %v1164_v2  ;;  %1026 = vmatprep.mubr.msk.f32.mxu1 %vm1128_vm1, %v1127_v3 }
 0x1ba   :  { %1012 = vmatprep.subr.mxu1 %v1127_v3 }
 0x1bb   :  { %1013 = vmatpush3.msra.mxu1 %v1170_v4 }
 0x1bc   :  { %1014 = vmatprep.subr.mxu1 %v1127_v3 }
 0x1bd   :  { %1015 = vmatpush3.msra.mxu1 %v1187_v8 }
 0x1be   :  { %1016 = vmatprep.subr.mxu1 %v1127_v3 }
 0x1bf   :  { %1017 = vmatpush3.msra.mxu1 %v1197_v10 }
 0x1c0   :  { %1018 = vmatprep.subr.mxu1 %v1127_v3 }
 0x1c1   :  { %1019 = vmatpush3.msra.mxu1 %v1204_v11 }
 0x1c2   :  { %1020 = vmatprep.subr.mxu1 %v1127_v3 }
 0x1c3   :  { %1021 = vmatpush3.msra.mxu1 %v1212_v12 }
 0x1c4   :  { %1022 = vmatprep.subr.mxu1 %v1127_v3 }
 0x1c5   :  { %1023 = vmatpush3.msra.mxu1 %v1222_v13 }
 0x1c6   :  { %1024 = vmatprep.subr.mxu1 %v1127_v3 }
 0x1c7   :  { %1025 = vmatpush3.msra.mxu1 %v1231_v14 }
 0x1c8   :  { %1048 = vmatprep.subr.mxu1 %v1127_v3 }
 0x278   :  { %v408_v49 = vpop.f32.mrf.mxu1 }
 0x279   :  { %v412_v50 = vadd.f32 %v408_v49, %v338_v48 }
 0x27a   :  { %v990_v51 = vpop.f32.mrf.mxu1 }
 0x27b   :  { %1093 = vtanh.f32 %v412_v50 }
 0x288   :  { %v1094_v52 = vpop.eup %1093 }
 0x289   :  { %1008 = vmatmul.mubr.msk.f32.vlgmr.msra.gmra.mxu0 %vm167_vm2, %v1094_v52 }
 0x28a   :  { %1030 = vmatpush3.msra.mxu0 %v1164_v2  ;;  %1045 = vmatprep.mubr.msk.f32.mxu0 %vm1128_vm1, %v1127_v3 }
 0x28b   :  { %1031 = vmatprep.subr.mxu0 %v1127_v3 }
 0x28c   :  { %1032 = vmatpush3.msra.mxu0 %v1170_v4 }
 0x28d   :  { %1033 = vmatprep.subr.mxu0 %v1127_v3 }
 0x28e   :  { %1034 = vmatpush3.msra.mxu0 %v1187_v8 }
 0x28f   :  { %1035 = vmatprep.subr.mxu0 %v1127_v3 }
 0x290   :  { %1036 = vmatpush3.msra.mxu0 %v1197_v10 }
 0x291   :  { %1037 = vmatprep.subr.mxu0 %v1127_v3 }
 0x292   :  { %1038 = vmatpush3.msra.mxu0 %v1204_v11 }
 0x293   :  { %1039 = vmatprep.subr.mxu0 %v1127_v3 }
 0x294   :  { %1040 = vmatpush3.msra.mxu0 %v1212_v12 }
 0x295   :  { %1041 = vmatprep.subr.mxu0 %v1127_v3 }
 0x296   :  { %1042 = vmatpush3.msra.mxu0 %v1222_v13 }
 0x297   :  { %1043 = vmatprep.subr.mxu0 %v1127_v3 }
 0x298   :  { %1044 = vmatpush3.msra.mxu0 %v1231_v14 }
 0x299   :  { %1067 = vmatprep.subr.mxu0 %v1127_v3 }
 0x349   :  { %v485_v54 = vpop.f32.mrf.mxu0 }
 0x34a   :  { %v489_v55 = vadd.f32 %v485_v54, %v415_v53 }
 0x34b   :  { %v1009_v56 = vpop.f32.mrf.mxu0 }
 0x34c   :  { %1095 = vtanh.f32 %v489_v55 }
 0x359   :  { %v1096_v57 = vpop.eup %1095 }
 0x35a   :  { %1027 = vmatmul.mubr.msk.f32.vlgmr.msra.gmra.mxu1 %vm167_vm2, %v1096_v57 }
 0x35b   :  { %1049 = vmatpush3.msra.mxu1 %v1164_v2  ;;  %1064 = vmatprep.mubr.msk.f32.mxu1 %vm1128_vm1, %v1127_v3 }
 0x35c   :  { %1050 = vmatprep.subr.mxu1 %v1127_v3 }
 0x35d   :  { %1051 = vmatpush3.msra.mxu1 %v1170_v4 }
 0x35e   :  { %1052 = vmatprep.subr.mxu1 %v1127_v3 }
 0x35f   :  { %1053 = vmatpush3.msra.mxu1 %v1187_v8 }
 0x360   :  { %1054 = vmatprep.subr.mxu1 %v1127_v3 }
 0x361   :  { %1055 = vmatpush3.msra.mxu1 %v1197_v10 }
 0x362   :  { %1056 = vmatprep.subr.mxu1 %v1127_v3 }
 0x363   :  { %1057 = vmatpush3.msra.mxu1 %v1204_v11 }
 0x364   :  { %1058 = vmatprep.subr.mxu1 %v1127_v3 }
 0x365   :  { %1059 = vmatpush3.msra.mxu1 %v1212_v12 }
 0x366   :  { %1060 = vmatprep.subr.mxu1 %v1127_v3 }
 0x367   :  { %1061 = vmatpush3.msra.mxu1 %v1222_v13 }
 0x368   :  { %1062 = vmatprep.subr.mxu1 %v1127_v3 }
 0x369   :  { %1063 = vmatpush3.msra.mxu1 %v1231_v14 }
 0x41a   :  { %v562_v59 = vpop.f32.mrf.mxu1 }
 0x41b   :  { %v566_v60 = vadd.f32 %v562_v59, %v492_v58 }
 0x41c   :  { %v1028_v61 = vpop.f32.mrf.mxu1 }
 0x41d   :  { %1097 = vtanh.f32 %v566_v60 }
 0x42a   :  { %v1098_v62 = vpop.eup %1097 }
 0x42b   :  { %1046 = vmatmul.mubr.msk.f32.vlgmr.msra.gmra.mxu0 %vm167_vm2, %v1098_v62 }
 0x42c   :  { %1068 = vmatpush3.msra.mxu0 %v1164_v2  ;;  %1083 = vmatprep.mubr.msk.f32.mxu0 %vm1128_vm1, %v1127_v3 }
 0x42d   :  { %1069 = vmatprep.subr.mxu0 %v1127_v3 }
 0x42e   :  { %1070 = vmatpush3.msra.mxu0 %v1170_v4 }
 0x42f   :  { %1071 = vmatprep.subr.mxu0 %v1127_v3 }
 0x430   :  { %1072 = vmatpush3.msra.mxu0 %v1187_v8 }
 0x431   :  { %1073 = vmatprep.subr.mxu0 %v1127_v3 }
 0x432   :  { %1074 = vmatpush3.msra.mxu0 %v1197_v10  ;;  %v723_v10 = vld [vmem:[#allocation2 + $0x38] sm:$0xff] }
 0x433   :  { %1075 = vmatprep.subr.mxu0 %v1127_v3 }
 0x434   :  { %1076 = vmatpush3.msra.mxu0 %v1204_v11 }
 0x435   :  { %1077 = vmatprep.subr.mxu0 %v1127_v3 }
 0x436   :  { %1078 = vmatpush3.msra.mxu0 %v1212_v12 }
 0x437   :  { %1079 = vmatprep.subr.mxu0 %v1127_v3 }
 0x438   :  { %1080 = vmatpush3.msra.mxu0 %v1222_v13 }
 0x439   :  { %1081 = vmatprep.subr.mxu0 %v1127_v3 }
 0x43a   :  { %1082 = vmatpush3.msra.mxu0 %v1231_v14 }
 0x4eb   :  { %v639_v0 = vpop.f32.mrf.mxu0 }
 0x4ec   :  { %v643_v1 = vadd.f32 %v639_v0, %v569_v63 }
 0x4ed   :  { %v1047_v2 = vpop.f32.mrf.mxu0 }
 0x4ee   :  { %1099 = vtanh.f32 %v643_v1 }
 0x4fb   :  { %v1100_v4 = vpop.eup %1099 }
 0x4fc   :  { %1065 = vmatmul.mubr.msk.f32.vlgmr.msra.gmra.mxu1 %vm167_vm2, %v1100_v4 }
 0x5bc   :  { %v716_v6 = vpop.f32.mrf.mxu1 }
 0x5bd   :  { %v720_v7 = vadd.f32 %v716_v6, %v646_v5 }
 0x5be   :  { %v1066_v8 = vpop.f32.mrf.mxu1 }
 0x5bf   :  { %1101 = vtanh.f32 %v720_v7 }
 0x5cc   :  { %v1102_v9 = vpop.eup %1101 }
 0x5cd   :  { %1084 = vmatmul.mubr.msk.f32.vlgmr.msra.gmra.mxu0 %vm167_vm2, %v1102_v9 }
 0x68d   :  { %v793_v3 = vpop.f32.mrf.mxu0 }
 0x68e   :  { %v797_v11 = vadd.f32 %v793_v3, %v723_v10 }
 0x68f   :  { %v1085_v12 = vpop.f32.mrf.mxu0 }
 0x690   :  { %1103 = vtanh.f32 %v797_v11 }
 0x69d   :  { %v1104_v13 = vpop.eup %1103 }
 0x69e   :  { %799 = vst.msk [vmem:[#allocation3] sm:$0xff] %vm167_vm2, %v1104_v13 }
 0x69f   :  { %1116 = shalt.err (!%p1113_p4)
}
 0x6a0   :  { %809 = dma.vmem_to_hbm [thread:$0]  %s807_s3, 128, %s1410_s4, [#allocation4]  }
 0x6a1   :  { %1125 = dma.done.wait [#allocation4], 128  }
 0x6a2   :  { %1126 = vsyncadd [#allocation4], 4294967168 }
 0x6a3   :  { %813 = vsyncpa [#allocation4], 1 }

</bundles_post_ra>
